<compile_context>
chip_gen: v6e
topology: v6e:2x2x1
jax: 0.10.0
libtpu: 0.0.40
codegen_flags: <defaults>
</compile_context>

<pallas_src>
import functools

import jax
import jax.numpy as jnp
from jax import lax
from jax.experimental import pallas as pl
from jax.experimental.pallas import tpu as pltpu


def _masked_loss_kernel(pred_ref, targ_ref, mask_ref, out_d_ref, out_m_ref,
                        acc_d, acc_m, *, loss, n_cols, tn, bps, exact):
    i = pl.program_id(0)   # shard axis ("parallel": uses both TCs on v7x)
    j = pl.program_id(1)   # feature-chunk reduction axis ("arbitrary")

    @pl.when(j == 0)
    def _init():
        acc_d[...] = jnp.zeros_like(acc_d)
        acc_m[...] = jnp.zeros_like(acc_m)

    p = pred_ref[...].astype(jnp.float32)
    t = targ_ref[...].astype(jnp.float32)
    m = mask_ref[...].astype(jnp.float32)

    d = (p - t) * m                       # == pred*mask - target*mask
    contrib = jnp.abs(d) if loss == 'l1' else d * d

    if exact:
        # Every block is fully in range: pure elementwise VPU accumulation.
        acc_d[...] += contrib
        acc_m[...] += m
    else:
        start = (i * bps + j) * tn        # intended global column offset

        @pl.when(start + tn <= n_cols)
        def _full_block():
            acc_d[...] += contrib
            acc_m[...] += m

        @pl.when(start + tn > n_cols)
        def _partial_block():
            # Masks both the ragged last block and fully out-of-range shard
            # blocks (whose index_map was clamped); garbage lanes contribute 0.
            col = lax.broadcasted_iota(jnp.int32, contrib.shape, 1) + start
            valid = col < n_cols
            acc_d[...] += jnp.where(valid, contrib, 0.0)
            acc_m[...] += jnp.where(valid, m, 0.0)

    @pl.when(j == bps - 1)
    def _finalize():
        # One-time cross-lane reduce per shard; broadcast into a lane-dense
        # (8,128) output block (unmasked vst, read back as [0,0] per shard).
        out_d_ref[...] = jnp.full(out_d_ref.shape, jnp.sum(acc_d[...]),
                                  jnp.float32)
        out_m_ref[...] = jnp.full(out_m_ref.shape, jnp.sum(acc_m[...]),
                                  jnp.float32)


def _vmem_capacity_bytes():
    try:
        info = pltpu.get_tpu_info()
        cap = getattr(info, 'vmem_capacity_bytes', None)
        if cap:
            return int(cap)
    except Exception:
        pass
    return 64 * 1024 * 1024   # conservative: v7x per-TC physical VMEM


def masked_loss(pred, target, mask, loss='l1', loss_dim=None, num_shards=2):
    """Pallas implementation of MaskedLoss.forward."""
    assert pred.shape == target.shape
    assert mask.shape == pred.shape, "mask must have the same shape as pred"

    if loss_dim is not None:
        pred = pred[..., loss_dim]
        target = target[..., loss_dim]
        mask = mask[..., loss_dim]
    if not jnp.issubdtype(mask.dtype, jnp.floating):
        mask = mask.astype(jnp.float32)

    n = int(pred.size)
    # Fold into an 8-sublane-dense slab when divisibility allows (free reshape).
    rows = 8
    while n % rows:
        rows //= 2
    n_cols = n // rows

    pred2 = pred.reshape(rows, n_cols)
    targ2 = target.reshape(rows, n_cols)
    mask2 = mask.reshape(rows, n_cols)

    # ---- block sizing from the VMEM budget (HBM-bandwidth bound) ----
    # working set ~= 3 inputs * 2 pipeline buffers * block + 2 block-sized accs
    vmem_cap = _vmem_capacity_bytes()
    blk_bytes = int(vmem_cap * 0.55) // 8
    tn_max = max(128, (blk_bytes // (rows * 4)) // 128 * 128)

    if n_cols <= tn_max:
        tn = n_cols                 # single full-extent block (no masking)
    else:
        tn = tn_max                 # multiple of 128; remainder masked in-kernel

    total_blocks = pl.cdiv(n_cols, tn)
    num_shards = max(1, min(num_shards, total_blocks))
    bps = pl.cdiv(total_blocks, num_shards)   # blocks per shard
    exact = (tn * total_blocks == n_cols) and (bps * num_shards == total_blocks)

    def in_map(i, j):
        b = i * bps + j
        if not exact:
            b = jnp.minimum(b, total_blocks - 1)   # clamp over-covered blocks
        return (0, b)

    out_map = lambda i, j: (i, 0)

    kernel = functools.partial(_masked_loss_kernel, loss=loss, n_cols=n_cols,
                               tn=tn, bps=bps, exact=exact)

    out_shape = (jax.ShapeDtypeStruct((num_shards * 8, 128), jnp.float32),
                 jax.ShapeDtypeStruct((num_shards * 8, 128), jnp.float32))

    out_d, out_m = pl.pallas_call(
        kernel,
        out_shape=out_shape,
        grid_spec=pltpu.PrefetchScalarGridSpec(
            num_scalar_prefetch=0,
            grid=(num_shards, bps),
            in_specs=[pl.BlockSpec((rows, tn), in_map),
                      pl.BlockSpec((rows, tn), in_map),
                      pl.BlockSpec((rows, tn), in_map)],
            out_specs=[pl.BlockSpec((8, 128), out_map),
                       pl.BlockSpec((8, 128), out_map)],
            scratch_shapes=[pltpu.VMEM((rows, tn), jnp.float32),
                            pltpu.VMEM((rows, tn), jnp.float32)],
        ),
        compiler_params=pltpu.CompilerParams(
            dimension_semantics=("parallel", "arbitrary"),
            vmem_limit_bytes=int(vmem_cap * 0.75)),
    )(pred2, targ2, mask2)

    # Combine the tiny per-shard partials (one value per shard block).
    sum_d = jnp.sum(out_d[::8, 0])
    sum_m = jnp.sum(out_m[::8, 0])
    # Note: division by zero when mask is all zeros — same behavior as the
    # reference PyTorch module.
    return sum_d / sum_m


def _masked_loss_ref(pred, target, mask, loss='l1', loss_dim=None):
    p = pred * mask
    t = target * mask
    if loss_dim is None:
        l = jnp.sum(jnp.abs(p - t)) if loss == 'l1' else jnp.sum((p - t) ** 2)
        n_el = jnp.sum(mask)
    else:
        ps, ts = p[..., loss_dim], t[..., loss_dim]
        l = jnp.sum(jnp.abs(ps - ts)) if loss == 'l1' else jnp.sum((ps - ts) ** 2)
        n_el = jnp.sum(mask[..., loss_dim])
    return l / n_el


if __name__ == "__main__":
    key = jax.random.PRNGKey(0)
    k1, k2, k3 = jax.random.split(key, 3)
    shape = (2, 4, 16, 16)
    pred = jax.random.normal(k1, shape, dtype=jnp.float32)
    target = jax.random.normal(k2, shape, dtype=jnp.float32)
    mask = (jax.random.uniform(k3, shape) > 0.5).astype(jnp.float32)

    l1 = masked_loss(pred, target, mask, loss='l1')
    jax.block_until_ready(l1)
    r1 = _masked_loss_ref(pred, target, mask, loss='l1')

    l2 = masked_loss(pred, target, mask, loss='l2')
    r2 = _masked_loss_ref(pred, target, mask, loss='l2')

    ld = masked_loss(pred, target, mask, loss='l1', loss_dim=3)
    rd = _masked_loss_ref(pred, target, mask, loss='l1', loss_dim=3)

    assert jnp.allclose(l1, r1, rtol=1e-5, atol=1e-6), (l1, r1)
    assert jnp.allclose(l2, r2, rtol=1e-5, atol=1e-6), (l2, r2)
    assert jnp.allclose(ld, rd, rtol=1e-5, atol=1e-6), (ld, rd)

    print("KERNEL_OK")
</pallas_src>

<mosaic_0001>
module attributes {stable_mosaic.version = 11 : i64} {
  func.func @_masked_loss_kernel(%arg0: i32, %arg1: i32, %arg2: memref<8x256xf32, #tpu.memory_space<vmem>>, %arg3: memref<8x256xf32, #tpu.memory_space<vmem>>, %arg4: memref<8x256xf32, #tpu.memory_space<vmem>>, %arg5: memref<8x128xf32, #tpu.memory_space<vmem>>, %arg6: memref<8x128xf32, #tpu.memory_space<vmem>>, %arg7: memref<8x256xf32, #tpu.memory_space<vmem>>, %arg8: memref<8x256xf32, #tpu.memory_space<vmem>>) attributes {dimension_semantics = [#tpu.dimension_semantics<parallel>, #tpu.dimension_semantics<arbitrary>], iteration_bounds = array<i64: 1, 1>, scalar_prefetch = 0 : i64, scratch_operands = 2 : i64, tpu.core_type = #tpu.core_type<tc>, window_params = [{transform_indices = @transform_0, window_bounds = array<i64: 8, 256>}, {transform_indices = @transform_1, window_bounds = array<i64: 8, 256>}, {transform_indices = @transform_2, window_bounds = array<i64: 8, 256>}, {transform_indices = @transform_3, window_bounds = array<i64: 8, 128>}, {transform_indices = @transform_4, window_bounds = array<i64: 8, 128>}]} {
    %c0_i32 = arith.constant 0 : i32
    %0 = arith.cmpi eq, %arg1, %c0_i32 : i32
    %1 = arith.extui %0 : i1 to i32
    %c0_i32_0 = arith.constant 0 : i32
    %2 = arith.cmpi ne, %1, %c0_i32_0 : i32
    scf.if %2 {
      %cst = arith.constant 0.000000e+00 : f32
      %18 = vector.broadcast %cst : f32 to vector<8x256xf32>
      %c0_16 = arith.constant 0 : index
      %c0_17 = arith.constant 0 : index
      %19 = vector.load %arg7[%c0_16, %c0_17] : memref<8x256xf32, #tpu.memory_space<vmem>>, vector<8x256xf32>
      tpu.vector_store %arg7[%c0_16, %c0_17], %18 {strides = array<i32>} : memref<8x256xf32, #tpu.memory_space<vmem>>, vector<8x256xf32>,
      %cst_18 = arith.constant 0.000000e+00 : f32
      %20 = vector.broadcast %cst_18 : f32 to vector<8x256xf32>
      %c0_19 = arith.constant 0 : index
      %c0_20 = arith.constant 0 : index
      %21 = vector.load %arg8[%c0_19, %c0_20] : memref<8x256xf32, #tpu.memory_space<vmem>>, vector<8x256xf32>
      tpu.vector_store %arg8[%c0_19, %c0_20], %20 {strides = array<i32>} : memref<8x256xf32, #tpu.memory_space<vmem>>, vector<8x256xf32>,
    } else {
    }
    %c0 = arith.constant 0 : index
    %c0_1 = arith.constant 0 : index
    %3 = vector.load %arg2[%c0, %c0_1] : memref<8x256xf32, #tpu.memory_space<vmem>>, vector<8x256xf32>
    %c0_2 = arith.constant 0 : index
    %c0_3 = arith.constant 0 : index
    %4 = vector.load %arg3[%c0_2, %c0_3] : memref<8x256xf32, #tpu.memory_space<vmem>>, vector<8x256xf32>
    %c0_4 = arith.constant 0 : index
    %c0_5 = arith.constant 0 : index
    %5 = vector.load %arg4[%c0_4, %c0_5] : memref<8x256xf32, #tpu.memory_space<vmem>>, vector<8x256xf32>
    %6 = arith.subf %3, %4 : vector<8x256xf32>
    %7 = arith.mulf %6, %5 : vector<8x256xf32>
    %8 = math.absf %7 : vector<8x256xf32>
    %c0_6 = arith.constant 0 : index
    %c0_7 = arith.constant 0 : index
    %9 = vector.load %arg7[%c0_6, %c0_7] : memref<8x256xf32, #tpu.memory_space<vmem>>, vector<8x256xf32>
    %10 = arith.addf %9, %8 : vector<8x256xf32>
    %c0_8 = arith.constant 0 : index
    %c0_9 = arith.constant 0 : index
    %11 = vector.load %arg7[%c0_8, %c0_9] : memref<8x256xf32, #tpu.memory_space<vmem>>, vector<8x256xf32>
    tpu.vector_store %arg7[%c0_8, %c0_9], %10 {strides = array<i32>} : memref<8x256xf32, #tpu.memory_space<vmem>>, vector<8x256xf32>,
    %c0_10 = arith.constant 0 : index
    %c0_11 = arith.constant 0 : index
    %12 = vector.load %arg8[%c0_10, %c0_11] : memref<8x256xf32, #tpu.memory_space<vmem>>, vector<8x256xf32>
    %13 = arith.addf %12, %5 : vector<8x256xf32>
    %c0_12 = arith.constant 0 : index
    %c0_13 = arith.constant 0 : index
    %14 = vector.load %arg8[%c0_12, %c0_13] : memref<8x256xf32, #tpu.memory_space<vmem>>, vector<8x256xf32>
    tpu.vector_store %arg8[%c0_12, %c0_13], %13 {strides = array<i32>} : memref<8x256xf32, #tpu.memory_space<vmem>>, vector<8x256xf32>,
    %c0_i32_14 = arith.constant 0 : i32
    %15 = arith.cmpi eq, %arg1, %c0_i32_14 : i32
    %16 = arith.extui %15 : i1 to i32
    %c0_i32_15 = arith.constant 0 : i32
    %17 = arith.cmpi ne, %16, %c0_i32_15 : i32
    scf.if %17 {
      %c0_16 = arith.constant 0 : index
      %c0_17 = arith.constant 0 : index
      %18 = vector.load %arg7[%c0_16, %c0_17] : memref<8x256xf32, #tpu.memory_space<vmem>>, vector<8x256xf32>
      %19 = vector.shape_cast %18 : vector<8x256xf32> to vector<1x8x256xf32>
      %cst = arith.constant dense<0.000000e+00> : vector<1xf32>
      %20 = vector.multi_reduction <add>, %19, %cst [1, 2] : vector<1x8x256xf32> to vector<1xf32>
      %21 = vector.shape_cast %20 : vector<1xf32> to vector<1x1x1xf32>
      %22 = vector.extract %21[0, 0, 0] : f32 from vector<1x1x1xf32>
      %23 = vector.broadcast %22 : f32 to vector<8x128xf32>
      %c0_18 = arith.constant 0 : index
      %c0_19 = arith.constant 0 : index
      %24 = vector.load %arg5[%c0_18, %c0_19] : memref<8x128xf32, #tpu.memory_space<vmem>>, vector<8x128xf32>
      tpu.vector_store %arg5[%c0_18, %c0_19], %23 {strides = array<i32>} : memref<8x128xf32, #tpu.memory_space<vmem>>, vector<8x128xf32>,
      %c0_20 = arith.constant 0 : index
      %c0_21 = arith.constant 0 : index
      %25 = vector.load %arg8[%c0_20, %c0_21] : memref<8x256xf32, #tpu.memory_space<vmem>>, vector<8x256xf32>
      %26 = vector.shape_cast %25 : vector<8x256xf32> to vector<1x8x256xf32>
      %cst_22 = arith.constant dense<0.000000e+00> : vector<1xf32>
      %27 = vector.multi_reduction <add>, %26, %cst_22 [1, 2] : vector<1x8x256xf32> to vector<1xf32>
      %28 = vector.shape_cast %27 : vector<1xf32> to vector<1x1x1xf32>
      %29 = vector.extract %28[0, 0, 0] : f32 from vector<1x1x1xf32>
      %30 = vector.broadcast %29 : f32 to vector<8x128xf32>
      %c0_23 = arith.constant 0 : index
      %c0_24 = arith.constant 0 : index
      %31 = vector.load %arg6[%c0_23, %c0_24] : memref<8x128xf32, #tpu.memory_space<vmem>>, vector<8x128xf32>
      tpu.vector_store %arg6[%c0_23, %c0_24], %30 {strides = array<i32>} : memref<8x128xf32, #tpu.memory_space<vmem>>, vector<8x128xf32>,
    } else {
    }
    return
  }
  func.func @transform_0(%arg0: i32, %arg1: i32) -> (i32, i32) {
    %c1_i32 = arith.constant 1 : i32
    %0 = arith.muli %arg0, %c1_i32 : i32
    %1 = arith.addi %0, %arg1 : i32
    %c0_i32 = arith.constant 0 : i32
    %c0_i32_0 = arith.constant 0 : i32
    return %c0_i32, %1 : i32, i32
  }
  func.func @transform_1(%arg0: i32, %arg1: i32) -> (i32, i32) {
    %c1_i32 = arith.constant 1 : i32
    %0 = arith.muli %arg0, %c1_i32 : i32
    %1 = arith.addi %0, %arg1 : i32
    %c0_i32 = arith.constant 0 : i32
    %c0_i32_0 = arith.constant 0 : i32
    return %c0_i32, %1 : i32, i32
  }
  func.func @transform_2(%arg0: i32, %arg1: i32) -> (i32, i32) {
    %c1_i32 = arith.constant 1 : i32
    %0 = arith.muli %arg0, %c1_i32 : i32
    %1 = arith.addi %0, %arg1 : i32
    %c0_i32 = arith.constant 0 : i32
    %c0_i32_0 = arith.constant 0 : i32
    return %c0_i32, %1 : i32, i32
  }
  func.func @transform_3(%arg0: i32, %arg1: i32) -> (i32, i32) {
    %c0_i32 = arith.constant 0 : i32
    %c0_i32_0 = arith.constant 0 : i32
    return %arg0, %c0_i32 : i32, i32
  }
  func.func @transform_4(%arg0: i32, %arg1: i32) -> (i32, i32) {
    %c0_i32 = arith.constant 0 : i32
    %c0_i32_0 = arith.constant 0 : i32
    return %arg0, %c0_i32 : i32, i32
  }
}

</mosaic_0001>

<bundles_post_ra>
// kernel: tpu_custom_call.1
= control target key start
LH: loop header
LB: loop body
LE: loop exit
PB: predicated region body
PF: predicated region fallthrough
CT: control target
= control target key end

     0   :  { %10 = vsyncpa [#allocation5], 0  ;;  %s326_s0 = inlined_call_operand.hbm [shape: f32[8,256], index: 0, kind: input, shape index: {}]   ;;  %s327_s1 = inlined_call_operand.hbm [shape: f32[8,256], index: 1, kind: input, shape index: {}]   ;;  %s328_s2 = inlined_call_operand.hbm [shape: f32[8,256], index: 2, kind: input, shape index: {}]   ;;  %s329_s3 = inlined_call_operand.hbm [shape: f32[8,128], index: 3, kind: output, shape index: {0}]   ;;  %s330_s4 = inlined_call_operand.hbm [shape: f32[8,128], index: 4, kind: output, shape index: {1}]  }
   0x1   :  { %11 = vsyncpa [#allocation8], 0 }
   0x2   :  { %12 = vsyncpa [#allocation6], 0 }
   0x3   :  { %13 = vsyncpa [#allocation12], 0  ;;  %s281_s15 = smov [#allocation7]   ;;  %s282_s17 = smov [#allocation4]  }
   0x4   :  { %s38_s16 = sshll.u32 %s281_s15, 4  ;;  %s24_s18 = sshll.u32 %s282_s17, 4  ;;  %s39_s16 = int_to_ptr.vmem [resolvable:$true] %s38_s16  ;;  %s25_s18 = int_to_ptr.vmem [resolvable:$true] %s24_s18 }
   0x5   :  { %s181_s19 = scalar_lea.vmem %s39_s16, 256  ;;  %p186_p1 = scmp.lt.s32.totalorder %s39_s16, %s39_s16 }
   0x6   :  { %p182_p0 = scmp.ne.s32.totalorder %s39_s16, %s181_s19  ;;  %p187_p2 = scmp.lt.s32.totalorder %s181_s19, %s181_s19 }
   0x8   :  { %p188_p3 = por %p187_p2, %p186_p1 }
   0xa   :  { %p189_p4 = pnand %p188_p3, %p182_p0 }
   0xc   :  { %192 = shalt.err (!%p189_p4)
}
   0xd   :  { %41 = dma.hbm_to_vmem [thread:$0]  %s327_s1, 256, %s39_s16, [#allocation8]  }
   0xe   :  { %s201_s22 = scalar_lea.vmem %s25_s18, 256  ;;  %p206_p6 = scmp.lt.s32.totalorder %s25_s18, %s25_s18 }
   0xf   :  { %p202_p5 = scmp.ne.s32.totalorder %s25_s18, %s201_s22  ;;  %p207_p7 = scmp.lt.s32.totalorder %s201_s22, %s201_s22 }
  0x11   :  { %p208_p8 = por %p207_p7, %p206_p6 }
  0x13   :  { %p209_p9 = pnand %p208_p8, %p202_p5 }
  0x15   :  { %212 = shalt.err (!%p209_p9)
}
  0x16   :  { %27 = dma.hbm_to_vmem [thread:$0]  %s326_s0, 256, %s25_s18, [#allocation5]  }
  0x17   :  { %s283_s25 = smov [#allocation9]  }
  0x18   :  { %s52_s26 = sshll.u32 %s283_s25, 4  ;;  %s53_s26 = int_to_ptr.vmem [resolvable:$true] %s52_s26 }
  0x19   :  { %s221_s27 = scalar_lea.vmem %s53_s26, 256  ;;  %p226_p11 = scmp.lt.s32.totalorder %s53_s26, %s53_s26 }
  0x1a   :  { %p222_p10 = scmp.ne.s32.totalorder %s53_s26, %s221_s27  ;;  %p227_p12 = scmp.lt.s32.totalorder %s221_s27, %s221_s27 }
  0x1c   :  { %p228_p13 = por %p227_p12, %p226_p11 }
  0x1e   :  { %p229_p0 = pnand %p228_p13, %p222_p10 }
  0x20   :  { %232 = shalt.err (!%p229_p0)
}
  0x21   :  { %55 = dma.hbm_to_vmem [thread:$0]  %s328_s2, 256, %s53_s26, [#allocation8]  }
  0x22   :  { %273 = dma.done.wait [#allocation5], 256  }
  0x23   :  { %274 = vsyncadd [#allocation5], 4294967040 }
  0x24   :  { %275 = dma.done.wait [#allocation8], 512  }
  0x25   :  { %276 = vsyncadd [#allocation8], 4294966784  ;;  %v79_v0 = vld [vmem:[#allocation4] sm:$0xff]  ;;  %v80_v1 = vld [vmem:[#allocation4 + $0x8] sm:$0xff]  ;;  %s284_s0 = smov [#allocation10]   ;;  %s285_s30 = smov [#allocation11]  }
  0x26   :  { %v81_v2 = vld [vmem:[#allocation7] sm:$0xff]  ;;  %v82_v3 = vld [vmem:[#allocation7 + $0x8] sm:$0xff]  ;;  %v83_v4 = vld [vmem:[#allocation9] sm:$0xff]  ;;  %s140_s2 = sshll.u32 %s284_s0, 4  ;;  %s150_s5 = sshll.u32 %s285_s30, 4  ;;  %s141_s2 = int_to_ptr.vmem [resolvable:$true] %s140_s2  ;;  %s151_s5 = int_to_ptr.vmem [resolvable:$true] %s150_s5 }
  0x27   :  { %v84_v5 = vld [vmem:[#allocation9 + $0x8] sm:$0xff]  ;;  %v85_v6 = vsub.f32 %v79_v0, %v81_v2  ;;  %v86_v7 = vsub.f32 %v80_v1, %v82_v3  ;;  %s233_s6 = scalar_lea.vmem %s141_s2, 128  ;;  %p238_p2 = scmp.lt.s32.totalorder %s141_s2, %s141_s2 }
  0x28   :  { %v122_v13 = vadd.f32 %v84_v5, %v83_v4  ;;  %p234_p1 = scmp.ne.s32.totalorder %s141_s2, %s233_s6  ;;  %p239_p3 = scmp.lt.s32.totalorder %s233_s6, %s233_s6 }
  0x29   :  { %v87_v8 = vmul.f32 %v85_v6, %v83_v4  ;;  %v88_v9 = vmul.f32 %v86_v7, %v84_v5 }
  0x2a   :  { %p240_p4 = por %p239_p3, %p238_p2 }
  0x2b   :  { %v89_v10 = vand.u32 2147483647, %v87_v8  ;;  %v90_v11 = vand.u32 2147483647, %v88_v9 }
  0x2c   :  { %p241_p5 = pnand %p240_p4, %p234_p1 }
  0x2d   :  { %v108_v12 = vadd.f32 %v90_v11, %v89_v10 }
  0x2f   :  { %109 = vadd.xlane.f32.xlu0 %v108_v12 }
  0x33   :  { %123 = vadd.xlane.f32.xlu0 %v122_v13 }
  0xb8   :  { %v110_v14 = vpop.xlane.xlu0 %109 }
  0xb9   :  { %v111_v15 = vrot.slane %v110_v14, 4 }
  0xbb   :  { %v112_v16 = vadd.f32 %v111_v15, %v110_v14 }
  0xbc   :  { %v124_v17 = vpop.xlane.xlu0 %123 }
  0xbd   :  { %v113_v18 = vrot.slane %v112_v16, 2  ;;  %v125_v19 = vrot.slane %v124_v17, 4 }
  0xbf   :  { %v126_v20 = vadd.f32 %v125_v19, %v124_v17  ;;  %v114_v21 = vadd.f32 %v113_v18, %v112_v16 }
  0xc1   :  { %v127_v22 = vrot.slane %v126_v20, 2  ;;  %v115_v23 = vrot.slane %v114_v21, 1 }
  0xc3   :  { %v128_v24 = vadd.f32 %v127_v22, %v126_v20  ;;  %v116_v25 = vadd.f32 %v115_v23, %v114_v21 }
  0xc5   :  { %164 = vpush %v116_v25  ;;  %v129_v26 = vrot.slane %v128_v24, 1 }
  0xc7   :  { %v130_v27 = vadd.f32 %v129_v26, %v128_v24 }
  0xc9   :  { %166 = vpush %v130_v27 }
  0xf6   :  { %s165_s29 = spop %164 }
  0xf7   :  { %v118_v28 = vstv %s165_s29 }
  0xf8   :  { %119 = vst [vmem:[#allocation10] sm:$0xff] %v118_v28 }
  0xf9   :  { %244 = shalt.err (!%p241_p5)
}
  0xfa   :  { %143 = dma.vmem_to_hbm [thread:$0]  %s141_s2, 128, %s329_s3, [#allocation6]  }
  0xfb   :  { %s167_s9 = spop %166  ;;  %s253_s10 = scalar_lea.vmem %s151_s5, 128 }
  0xfc   :  { %v132_v29 = vstv %s167_s9  ;;  %p254_p6 = scmp.ne.s32.totalorder %s151_s5, %s253_s10  ;;  %p258_p7 = scmp.lt.s32.totalorder %s151_s5, %s151_s5 }
  0xfd   :  { %133 = vst [vmem:[#allocation11] sm:$0xff] %v132_v29  ;;  %p259_p8 = scmp.lt.s32.totalorder %s253_s10, %s253_s10 }
  0xff   :  { %p260_p9 = por %p259_p8, %p258_p7 }
 0x101   :  { %p261_p10 = pnand %p260_p9, %p254_p6 }
 0x103   :  { %264 = shalt.err (!%p261_p10)
}
 0x104   :  { %153 = dma.vmem_to_hbm [thread:$0]  %s151_s5, 128, %s330_s4, [#allocation12]  }
 0x105   :  { %277 = dma.done.wait [#allocation6], 128  }
 0x106   :  { %278 = vsyncadd [#allocation6], 4294967168 }
 0x107   :  { %279 = dma.done.wait [#allocation12], 128  }
 0x108   :  { %280 = vsyncadd [#allocation12], 4294967168 }
 0x109   :  { %160 = vsyncpa [#allocation5], 1 }
 0x10a   :  { %161 = vsyncpa [#allocation8], 1 }
 0x10b   :  { %162 = vsyncpa [#allocation6], 1 }
 0x10c   :  { %163 = vsyncpa [#allocation12], 1 }

</bundles_post_ra>
